<compile_context>
chip_gen: v7x
topology: tpu7x:2x2x1
jax: 0.10.0
libtpu: 0.0.40
codegen_flags: <defaults>
</compile_context>

<pallas_src>
import jax
import jax.numpy as jnp
from jax import lax
from jax.experimental import pallas as pl
from jax.experimental.pallas import tpu as pltpu

# settings from tensorNewton.__init__ defaults
MAXITER = 10
FTOL = 1e-6
XTOL = 1e-6

LANES = 128
CHUNK = 32            # rows per in-register strip: 4 vregs per f32 operand plane
MAX_TILE_ROWS = 1024  # 1024x128 f32 = 512 KiB/plane; 5 planes double-buffered ~5 MiB


def _newton_kernel(x0_ref, a_ref, b_ref, c_ref, x_ref):
    """Newton iterations for one (tile_rows, 128) batch tile.

    The tile is processed in (CHUNK, 128) strips so the full 10-iteration
    Newton chain for a strip runs out of vregs: operands are loaded from VMEM
    once per strip and the solution is stored once per strip.
    """
    n_chunks = x_ref.shape[0] // CHUNK

    @pl.loop(0, n_chunks)
    def _(ci):
        r = pl.multiple_of(ci * CHUNK, CHUNK)
        sl = pl.ds(r, CHUNK)
        x0 = x0_ref[sl, :]
        a = a_ref[sl, :]
        b = b_ref[sl, :]
        c = c_ref[sl, :]

        def body(_, x):
            ax2 = a * x * x
            f = x * (ax2 + b) + c            # Horner: a*x^3 + b*x + c
            dfdx = 3.0 * ax2 + b             # exact analytic dG/dx (== autograd)
            # EUP approx reciprocal instead of the VPU divide expansion.
            step = f * pl.reciprocal(dfdx, approx=True)
            xnew = x - step
            # Per-element NaN freeze (PyTorch breaks the whole batch before
            # updating x on the first NaN; per-element freeze is the accepted
            # deviation -- no cross-lane reductions on the critical path).
            return jnp.where(jnp.isnan(f), x, xnew)

        x_ref[sl, :] = lax.fori_loop(0, MAXITER, body, x0, unroll=True)


def _ceil_to(n, m):
    return ((n + m - 1) // m) * m


def _tile_plan(B):
    """Pick (tile_rows, rows_pad) for a lane-dense (rows, 128) layout."""
    rows = _ceil_to(max(-(-B // LANES), 1), CHUNK)
    if rows > MAX_TILE_ROWS:
        tile_rows = MAX_TILE_ROWS
        rows_pad = _ceil_to(rows, MAX_TILE_ROWS)
    elif rows >= 2 * CHUNK:
        # >= 2 parallel grid tiles so v7x's two TensorCores both get work
        tile_rows = _ceil_to(-(-rows // 2), CHUNK)
        rows_pad = 2 * tile_rows
    else:
        tile_rows = rows
        rows_pad = rows
    return tile_rows, rows_pad


def tensor_newton(x0, a, b, c):
    """Pallas wrapper: lane-dense (rows, 128) layout, 4 separate inputs, tiled grid."""
    orig_shape = x0.shape
    out_dtype = x0.dtype

    def flat(t):
        return jnp.ravel(t).astype(jnp.float32)

    x0f, af, bf, cf = flat(x0), flat(a), flat(b), flat(c)
    B = x0f.shape[0]
    tile_rows, rows_pad = _tile_plan(B)
    bp = rows_pad * LANES

    # Padded lanes: x0=0, a=0, b=1, c=0 -> f=0, dfdx=1, step=0, never NaN.
    def pad(v, fill):
        return jnp.pad(v, (0, bp - B), constant_values=fill).reshape(rows_pad, LANES)

    spec = pl.BlockSpec((tile_rows, LANES), lambda i: (i, 0))
    out = pl.pallas_call(
        _newton_kernel,
        out_shape=jax.ShapeDtypeStruct((rows_pad, LANES), jnp.float32),
        grid=(rows_pad // tile_rows,),
        in_specs=[spec, spec, spec, spec],
        out_specs=spec,
        compiler_params=pltpu.CompilerParams(dimension_semantics=("parallel",)),
    )(pad(x0f, 0.0), pad(af, 0.0), pad(bf, 1.0), pad(cf, 0.0))

    return out.reshape(-1)[:B].reshape(orig_shape).astype(out_dtype)


# ---------------- pure-JAX reference (mirrors rtnobnd literally) ----------------
def _reference_newton(x0, a, b, c):
    x = x0
    it, ftol, xtol = 0, 1000.0, 10000.0
    while it < MAXITER and ftol > FTOL and xtol > XTOL:
        f = a * x**3 + b * x + c
        if bool(jnp.isnan(f).any()):
            break
        dfdx = 3.0 * a * x * x + b
        xnew = x - f / dfdx
        ftol = float(jnp.max(jnp.abs(f)))
        xtol = float(jnp.max(jnp.abs(xnew - x)))
        x = xnew
        it += 1
    return x


def _make_inputs(B, key):
    k1, k2 = jax.random.split(key)
    x0 = jax.random.normal(k1, (B, 1), dtype=jnp.float32)
    c = jax.random.normal(k2, (B, 1), dtype=jnp.float32)
    # deterministic "parameters" of G (strictly monotone cubic -> dfdx > 0)
    a = 0.5 + 0.1 * (jnp.arange(B, dtype=jnp.float32) % 17).reshape(B, 1)
    b = 1.0 + 0.05 * (jnp.arange(B, dtype=jnp.float32) % 13).reshape(B, 1)
    return x0, a, b, c


if __name__ == "__main__":
    key = jax.random.PRNGKey(0)
    k_small, k_big = jax.random.split(key)

    # small case (B=8)
    x0, a, b, c = _make_inputs(8, k_small)
    x = jax.block_until_ready(tensor_newton(x0, a, b, c))
    x_ref = _reference_newton(x0, a, b, c)
    assert x.shape == x0.shape and x.dtype == x0.dtype
    assert jnp.allclose(x, x_ref, atol=1e-5, rtol=1e-5), (x, x_ref)
    assert float(jnp.max(jnp.abs(a * x**3 + b * x + c))) < 1e-4

    # non-lane-aligned case (B=300): exercises padding of the lane-dense layout
    x0, a, b, c = _make_inputs(300, k_big)
    x = jax.block_until_ready(tensor_newton(x0, a, b, c))
    x_ref = _reference_newton(x0, a, b, c)
    assert jnp.allclose(x, x_ref, atol=1e-5, rtol=1e-5)
    assert float(jnp.max(jnp.abs(a * x**3 + b * x + c))) < 1e-4

    print("KERNEL_OK")
</pallas_src>

<mosaic_0001>
module attributes {stable_mosaic.version = 11 : i64} {
  func.func @_newton_kernel(%arg0: i32, %arg1: memref<32x128xf32, #tpu.memory_space<vmem>>, %arg2: memref<32x128xf32, #tpu.memory_space<vmem>>, %arg3: memref<32x128xf32, #tpu.memory_space<vmem>>, %arg4: memref<32x128xf32, #tpu.memory_space<vmem>>, %arg5: memref<32x128xf32, #tpu.memory_space<vmem>>) attributes {dimension_semantics = [#tpu.dimension_semantics<parallel>], iteration_bounds = array<i64: 1>, scalar_prefetch = 0 : i64, scratch_operands = 0 : i64, tpu.core_type = #tpu.core_type<tc>, window_params = [{transform_indices = @transform_0, window_bounds = array<i64: 32, 128>}, {transform_indices = @transform_1, window_bounds = array<i64: 32, 128>}, {transform_indices = @transform_2, window_bounds = array<i64: 32, 128>}, {transform_indices = @transform_3, window_bounds = array<i64: 32, 128>}, {transform_indices = @transform_4, window_bounds = array<i64: 32, 128>}]} {
    %c0_i32 = arith.constant 0 : i32
    %c1_i32 = arith.constant 1 : i32
    %0 = arith.muli %c0_i32, %c1_i32 : i32
    %c0_i32_0 = arith.constant 0 : i32
    %1 = arith.addi %c0_i32_0, %0 : i32
    %c32_i32 = arith.constant 32 : i32
    %2 = arith.muli %1, %c32_i32 : i32
    %3 = tpu.assume_multiple %2, 32 : i32
    %4 = arith.index_cast %3 : i32 to index
    %c0 = arith.constant 0 : index
    %5 = vector.load %arg1[%4, %c0] : memref<32x128xf32, #tpu.memory_space<vmem>>, vector<32x128xf32>
    %6 = arith.index_cast %3 : i32 to index
    %c0_1 = arith.constant 0 : index
    %7 = vector.load %arg2[%6, %c0_1] : memref<32x128xf32, #tpu.memory_space<vmem>>, vector<32x128xf32>
    %8 = arith.index_cast %3 : i32 to index
    %c0_2 = arith.constant 0 : index
    %9 = vector.load %arg3[%8, %c0_2] : memref<32x128xf32, #tpu.memory_space<vmem>>, vector<32x128xf32>
    %10 = arith.index_cast %3 : i32 to index
    %c0_3 = arith.constant 0 : index
    %11 = vector.load %arg4[%10, %c0_3] : memref<32x128xf32, #tpu.memory_space<vmem>>, vector<32x128xf32>
    %c0_i32_4 = arith.constant 0 : i32
    %12 = arith.mulf %7, %5 : vector<32x128xf32>
    %13 = arith.mulf %12, %5 : vector<32x128xf32>
    %14 = arith.addf %13, %9 : vector<32x128xf32>
    %15 = arith.mulf %5, %14 : vector<32x128xf32>
    %16 = arith.addf %15, %11 : vector<32x128xf32>
    %cst = arith.constant 3.000000e+00 : f32
    %17 = vector.broadcast %cst : f32 to vector<32x128xf32>
    %18 = arith.mulf %17, %13 : vector<32x128xf32>
    %19 = arith.addf %18, %9 : vector<32x128xf32>
    %20 = tpu.reciprocal %19 {approx = true} : vector<32x128xf32> -> vector<32x128xf32>
    %21 = arith.mulf %16, %20 : vector<32x128xf32>
    %22 = arith.subf %5, %21 : vector<32x128xf32>
    %23 = arith.cmpf one, %16, %16 : vector<32x128xf32>
    %24 = arith.select %23, %5, %22 : vector<32x128xi1>, vector<32x128xf32>
    %c1_i32_5 = arith.constant 1 : i32
    %25 = arith.mulf %7, %24 : vector<32x128xf32>
    %26 = arith.mulf %25, %24 : vector<32x128xf32>
    %27 = arith.addf %26, %9 : vector<32x128xf32>
    %28 = arith.mulf %24, %27 : vector<32x128xf32>
    %29 = arith.addf %28, %11 : vector<32x128xf32>
    %cst_6 = arith.constant 3.000000e+00 : f32
    %30 = vector.broadcast %cst_6 : f32 to vector<32x128xf32>
    %31 = arith.mulf %30, %26 : vector<32x128xf32>
    %32 = arith.addf %31, %9 : vector<32x128xf32>
    %33 = tpu.reciprocal %32 {approx = true} : vector<32x128xf32> -> vector<32x128xf32>
    %34 = arith.mulf %29, %33 : vector<32x128xf32>
    %35 = arith.subf %24, %34 : vector<32x128xf32>
    %36 = arith.cmpf one, %29, %29 : vector<32x128xf32>
    %37 = arith.select %36, %24, %35 : vector<32x128xi1>, vector<32x128xf32>
    %c2_i32 = arith.constant 2 : i32
    %38 = arith.mulf %7, %37 : vector<32x128xf32>
    %39 = arith.mulf %38, %37 : vector<32x128xf32>
    %40 = arith.addf %39, %9 : vector<32x128xf32>
    %41 = arith.mulf %37, %40 : vector<32x128xf32>
    %42 = arith.addf %41, %11 : vector<32x128xf32>
    %cst_7 = arith.constant 3.000000e+00 : f32
    %43 = vector.broadcast %cst_7 : f32 to vector<32x128xf32>
    %44 = arith.mulf %43, %39 : vector<32x128xf32>
    %45 = arith.addf %44, %9 : vector<32x128xf32>
    %46 = tpu.reciprocal %45 {approx = true} : vector<32x128xf32> -> vector<32x128xf32>
    %47 = arith.mulf %42, %46 : vector<32x128xf32>
    %48 = arith.subf %37, %47 : vector<32x128xf32>
    %49 = arith.cmpf one, %42, %42 : vector<32x128xf32>
    %50 = arith.select %49, %37, %48 : vector<32x128xi1>, vector<32x128xf32>
    %c3_i32 = arith.constant 3 : i32
    %51 = arith.mulf %7, %50 : vector<32x128xf32>
    %52 = arith.mulf %51, %50 : vector<32x128xf32>
    %53 = arith.addf %52, %9 : vector<32x128xf32>
    %54 = arith.mulf %50, %53 : vector<32x128xf32>
    %55 = arith.addf %54, %11 : vector<32x128xf32>
    %cst_8 = arith.constant 3.000000e+00 : f32
    %56 = vector.broadcast %cst_8 : f32 to vector<32x128xf32>
    %57 = arith.mulf %56, %52 : vector<32x128xf32>
    %58 = arith.addf %57, %9 : vector<32x128xf32>
    %59 = tpu.reciprocal %58 {approx = true} : vector<32x128xf32> -> vector<32x128xf32>
    %60 = arith.mulf %55, %59 : vector<32x128xf32>
    %61 = arith.subf %50, %60 : vector<32x128xf32>
    %62 = arith.cmpf one, %55, %55 : vector<32x128xf32>
    %63 = arith.select %62, %50, %61 : vector<32x128xi1>, vector<32x128xf32>
    %c4_i32 = arith.constant 4 : i32
    %64 = arith.mulf %7, %63 : vector<32x128xf32>
    %65 = arith.mulf %64, %63 : vector<32x128xf32>
    %66 = arith.addf %65, %9 : vector<32x128xf32>
    %67 = arith.mulf %63, %66 : vector<32x128xf32>
    %68 = arith.addf %67, %11 : vector<32x128xf32>
    %cst_9 = arith.constant 3.000000e+00 : f32
    %69 = vector.broadcast %cst_9 : f32 to vector<32x128xf32>
    %70 = arith.mulf %69, %65 : vector<32x128xf32>
    %71 = arith.addf %70, %9 : vector<32x128xf32>
    %72 = tpu.reciprocal %71 {approx = true} : vector<32x128xf32> -> vector<32x128xf32>
    %73 = arith.mulf %68, %72 : vector<32x128xf32>
    %74 = arith.subf %63, %73 : vector<32x128xf32>
    %75 = arith.cmpf one, %68, %68 : vector<32x128xf32>
    %76 = arith.select %75, %63, %74 : vector<32x128xi1>, vector<32x128xf32>
    %c5_i32 = arith.constant 5 : i32
    %77 = arith.mulf %7, %76 : vector<32x128xf32>
    %78 = arith.mulf %77, %76 : vector<32x128xf32>
    %79 = arith.addf %78, %9 : vector<32x128xf32>
    %80 = arith.mulf %76, %79 : vector<32x128xf32>
    %81 = arith.addf %80, %11 : vector<32x128xf32>
    %cst_10 = arith.constant 3.000000e+00 : f32
    %82 = vector.broadcast %cst_10 : f32 to vector<32x128xf32>
    %83 = arith.mulf %82, %78 : vector<32x128xf32>
    %84 = arith.addf %83, %9 : vector<32x128xf32>
    %85 = tpu.reciprocal %84 {approx = true} : vector<32x128xf32> -> vector<32x128xf32>
    %86 = arith.mulf %81, %85 : vector<32x128xf32>
    %87 = arith.subf %76, %86 : vector<32x128xf32>
    %88 = arith.cmpf one, %81, %81 : vector<32x128xf32>
    %89 = arith.select %88, %76, %87 : vector<32x128xi1>, vector<32x128xf32>
    %c6_i32 = arith.constant 6 : i32
    %90 = arith.mulf %7, %89 : vector<32x128xf32>
    %91 = arith.mulf %90, %89 : vector<32x128xf32>
    %92 = arith.addf %91, %9 : vector<32x128xf32>
    %93 = arith.mulf %89, %92 : vector<32x128xf32>
    %94 = arith.addf %93, %11 : vector<32x128xf32>
    %cst_11 = arith.constant 3.000000e+00 : f32
    %95 = vector.broadcast %cst_11 : f32 to vector<32x128xf32>
    %96 = arith.mulf %95, %91 : vector<32x128xf32>
    %97 = arith.addf %96, %9 : vector<32x128xf32>
    %98 = tpu.reciprocal %97 {approx = true} : vector<32x128xf32> -> vector<32x128xf32>
    %99 = arith.mulf %94, %98 : vector<32x128xf32>
    %100 = arith.subf %89, %99 : vector<32x128xf32>
    %101 = arith.cmpf one, %94, %94 : vector<32x128xf32>
    %102 = arith.select %101, %89, %100 : vector<32x128xi1>, vector<32x128xf32>
    %c7_i32 = arith.constant 7 : i32
    %103 = arith.mulf %7, %102 : vector<32x128xf32>
    %104 = arith.mulf %103, %102 : vector<32x128xf32>
    %105 = arith.addf %104, %9 : vector<32x128xf32>
    %106 = arith.mulf %102, %105 : vector<32x128xf32>
    %107 = arith.addf %106, %11 : vector<32x128xf32>
    %cst_12 = arith.constant 3.000000e+00 : f32
    %108 = vector.broadcast %cst_12 : f32 to vector<32x128xf32>
    %109 = arith.mulf %108, %104 : vector<32x128xf32>
    %110 = arith.addf %109, %9 : vector<32x128xf32>
    %111 = tpu.reciprocal %110 {approx = true} : vector<32x128xf32> -> vector<32x128xf32>
    %112 = arith.mulf %107, %111 : vector<32x128xf32>
    %113 = arith.subf %102, %112 : vector<32x128xf32>
    %114 = arith.cmpf one, %107, %107 : vector<32x128xf32>
    %115 = arith.select %114, %102, %113 : vector<32x128xi1>, vector<32x128xf32>
    %c8_i32 = arith.constant 8 : i32
    %116 = arith.mulf %7, %115 : vector<32x128xf32>
    %117 = arith.mulf %116, %115 : vector<32x128xf32>
    %118 = arith.addf %117, %9 : vector<32x128xf32>
    %119 = arith.mulf %115, %118 : vector<32x128xf32>
    %120 = arith.addf %119, %11 : vector<32x128xf32>
    %cst_13 = arith.constant 3.000000e+00 : f32
    %121 = vector.broadcast %cst_13 : f32 to vector<32x128xf32>
    %122 = arith.mulf %121, %117 : vector<32x128xf32>
    %123 = arith.addf %122, %9 : vector<32x128xf32>
    %124 = tpu.reciprocal %123 {approx = true} : vector<32x128xf32> -> vector<32x128xf32>
    %125 = arith.mulf %120, %124 : vector<32x128xf32>
    %126 = arith.subf %115, %125 : vector<32x128xf32>
    %127 = arith.cmpf one, %120, %120 : vector<32x128xf32>
    %128 = arith.select %127, %115, %126 : vector<32x128xi1>, vector<32x128xf32>
    %c9_i32 = arith.constant 9 : i32
    %129 = arith.mulf %7, %128 : vector<32x128xf32>
    %130 = arith.mulf %129, %128 : vector<32x128xf32>
    %131 = arith.addf %130, %9 : vector<32x128xf32>
    %132 = arith.mulf %128, %131 : vector<32x128xf32>
    %133 = arith.addf %132, %11 : vector<32x128xf32>
    %cst_14 = arith.constant 3.000000e+00 : f32
    %134 = vector.broadcast %cst_14 : f32 to vector<32x128xf32>
    %135 = arith.mulf %134, %130 : vector<32x128xf32>
    %136 = arith.addf %135, %9 : vector<32x128xf32>
    %137 = tpu.reciprocal %136 {approx = true} : vector<32x128xf32> -> vector<32x128xf32>
    %138 = arith.mulf %133, %137 : vector<32x128xf32>
    %139 = arith.subf %128, %138 : vector<32x128xf32>
    %140 = arith.cmpf one, %133, %133 : vector<32x128xf32>
    %141 = arith.select %140, %128, %139 : vector<32x128xi1>, vector<32x128xf32>
    %142 = arith.index_cast %3 : i32 to index
    %c0_15 = arith.constant 0 : index
    %143 = vector.load %arg5[%142, %c0_15] : memref<32x128xf32, #tpu.memory_space<vmem>>, vector<32x128xf32>
    tpu.vector_store %arg5[%142, %c0_15], %141 {strides = array<i32>} : memref<32x128xf32, #tpu.memory_space<vmem>>, vector<32x128xf32>,
    %c1_i32_16 = arith.constant 1 : i32
    return
  }
  func.func @transform_0(%arg0: i32) -> (i32, i32) {
    %c0_i32 = arith.constant 0 : i32
    %c0_i32_0 = arith.constant 0 : i32
    return %arg0, %c0_i32 : i32, i32
  }
  func.func @transform_1(%arg0: i32) -> (i32, i32) {
    %c0_i32 = arith.constant 0 : i32
    %c0_i32_0 = arith.constant 0 : i32
    return %arg0, %c0_i32 : i32, i32
  }
  func.func @transform_2(%arg0: i32) -> (i32, i32) {
    %c0_i32 = arith.constant 0 : i32
    %c0_i32_0 = arith.constant 0 : i32
    return %arg0, %c0_i32 : i32, i32
  }
  func.func @transform_3(%arg0: i32) -> (i32, i32) {
    %c0_i32 = arith.constant 0 : i32
    %c0_i32_0 = arith.constant 0 : i32
    return %arg0, %c0_i32 : i32, i32
  }
  func.func @transform_4(%arg0: i32) -> (i32, i32) {
    %c0_i32 = arith.constant 0 : i32
    %c0_i32_0 = arith.constant 0 : i32
    return %arg0, %c0_i32 : i32, i32
  }
}

</mosaic_0001>

<bundles_post_ra>
// kernel: tpu_custom_call.1
= control target key start
LH: loop header
LB: loop body
LE: loop exit
PB: predicated region body
PF: predicated region fallthrough
CT: control target
= control target key end

     0   :  { %9 = vsyncpa [#allocation3], 0  ;;  %s1130_s0 = inlined_call_operand.hbm [shape: f32[32,128], index: 0, kind: input, shape index: {}]   ;;  %s1131_s1 = inlined_call_operand.hbm [shape: f32[32,128], index: 1, kind: input, shape index: {}]   ;;  %s1132_s2 = inlined_call_operand.hbm [shape: f32[32,128], index: 2, kind: input, shape index: {}]   ;;  %s1133_s3 = inlined_call_operand.hbm [shape: f32[32,128], index: 3, kind: input, shape index: {}]   ;;  %s1134_s4 = inlined_call_operand.hbm [shape: f32[32,128], index: 4, kind: output, shape index: {}]  }
   0x1   :  { %10 = vsyncpa [#allocation6], 0 }
   0x2   :  { %11 = vsyncpa [#allocation9], 0 }
   0x3   :  { %12 = vsyncpa [#allocation4], 0  ;;  %s797_s15 = smov [#allocation5]   ;;  %s798_s17 = smov [#allocation2]  }
   0x4   :  { %s30_s16 = sshll.u32 %s797_s15, 4  ;;  %s18_s18 = sshll.u32 %s798_s17, 4  ;;  %s31_s16 = int_to_ptr.vmem [resolvable:$true] %s30_s16  ;;  %s829_s18 = int_to_ptr.vmem [resolvable:$true] %s18_s18 }
   0x5   :  { %s679_s21 = scalar_lea.hbm %s1131_s1, 512 }
   0x6   :  { %p680_p0 = scmp.ne.s32.totalorder %s1131_s1, %s679_s21  ;;  %p683_p1 = scmp.lt.u32.totalorder %s679_s21, %s1131_s1 }
   0x8   :  { %p685_p2 = pnand %p683_p1, %p680_p0 }
   0xa   :  { %688 = shalt.err (!%p685_p2)
}
   0xb   :  { %s689_s26 = scalar_lea.vmem %s31_s16, 512  ;;  %p694_p4 = scmp.lt.s32.totalorder %s31_s16, %s31_s16 }
   0xc   :  { %p690_p3 = scmp.ne.s32.totalorder %s31_s16, %s689_s26  ;;  %p695_p5 = scmp.lt.s32.totalorder %s689_s26, %s689_s26 }
   0xe   :  { %p696_p6 = por %p695_p5, %p694_p4 }
  0x10   :  { %p697_p7 = pnand %p696_p6, %p690_p3 }
  0x12   :  { %700 = shalt.err (!%p697_p7)
}
  0x13   :  { %s799_s27 = smov 128   ;;  %s800_s28 = smov 8  }
  0x14   :  { %36 = dma.hbm_to_vmem [thread:$0]  %s1131_s1, 512, %s31_s16, [#allocation6], %s799_s27, %s799_s27, %s800_s28  }
  0x15   :  { %s701_s7 = scalar_lea.hbm %s1130_s0, 512 }
  0x16   :  { %p702_p8 = scmp.ne.s32.totalorder %s1130_s0, %s701_s7  ;;  %p705_p9 = scmp.lt.u32.totalorder %s701_s7, %s1130_s0 }
  0x18   :  { %p707_p10 = pnand %p705_p9, %p702_p8 }
  0x1a   :  { %710 = shalt.err (!%p707_p10)
}
  0x1b   :  { %s711_s12 = scalar_lea.vmem %s829_s18, 512  ;;  %p716_p12 = scmp.lt.s32.totalorder %s829_s18, %s829_s18 }
  0x1c   :  { %p712_p11 = scmp.ne.s32.totalorder %s829_s18, %s711_s12  ;;  %p717_p13 = scmp.lt.s32.totalorder %s711_s12, %s711_s12 }
  0x1e   :  { %p718_p0 = por %p717_p13, %p716_p12 }
  0x20   :  { %p719_p1 = pnand %p718_p0, %p712_p11 }
  0x22   :  { %722 = shalt.err (!%p719_p1)
}
  0x23   :  { %24 = dma.hbm_to_vmem [thread:$0]  %s1130_s0, 512, %s829_s18, [#allocation3], %s799_s27, %s799_s27, %s800_s28  }
  0x24   :  { %s801_s14 = smov [#allocation7]   ;;  %s802_s16 = smov [#allocation8]  }
  0x25   :  { %s42_s15 = sshll.u32 %s801_s14, 4  ;;  %s54_s17 = sshll.u32 %s802_s16, 4  ;;  %s43_s15 = int_to_ptr.vmem [resolvable:$true] %s42_s15  ;;  %s866_s17 = int_to_ptr.vmem [resolvable:$true] %s54_s17 }
  0x26   :  { %s723_s21 = scalar_lea.hbm %s1132_s2, 512 }
  0x27   :  { %p724_p2 = scmp.ne.s32.totalorder %s1132_s2, %s723_s21  ;;  %p727_p3 = scmp.lt.u32.totalorder %s723_s21, %s1132_s2 }
  0x29   :  { %p729_p4 = pnand %p727_p3, %p724_p2 }
  0x2b   :  { %732 = shalt.err (!%p729_p4)
}
  0x2c   :  { %s733_s0 = scalar_lea.vmem %s43_s15, 512  ;;  %p738_p6 = scmp.lt.s32.totalorder %s43_s15, %s43_s15 }
  0x2d   :  { %p734_p5 = scmp.ne.s32.totalorder %s43_s15, %s733_s0  ;;  %p739_p7 = scmp.lt.s32.totalorder %s733_s0, %s733_s0 }
  0x2f   :  { %p740_p8 = por %p739_p7, %p738_p6 }
  0x31   :  { %p741_p9 = pnand %p740_p8, %p734_p5 }
  0x33   :  { %744 = shalt.err (!%p741_p9)
}
  0x34   :  { %48 = dma.hbm_to_vmem [thread:$0]  %s1132_s2, 512, %s43_s15, [#allocation6], %s799_s27, %s799_s27, %s800_s28  }
  0x35   :  { %s745_s5 = scalar_lea.hbm %s1133_s3, 512 }
  0x36   :  { %p746_p10 = scmp.ne.s32.totalorder %s1133_s3, %s745_s5  ;;  %p749_p11 = scmp.lt.u32.totalorder %s745_s5, %s1133_s3 }
  0x38   :  { %p751_p12 = pnand %p749_p11, %p746_p10 }
  0x3a   :  { %754 = shalt.err (!%p751_p12)
}
  0x3b   :  { %s755_s10 = scalar_lea.vmem %s866_s17, 512  ;;  %p760_p0 = scmp.lt.s32.totalorder %s866_s17, %s866_s17 }
  0x3c   :  { %p756_p13 = scmp.ne.s32.totalorder %s866_s17, %s755_s10  ;;  %p761_p1 = scmp.lt.s32.totalorder %s755_s10, %s755_s10 }
  0x3e   :  { %p762_p2 = por %p761_p1, %p760_p0 }
  0x40   :  { %p763_p3 = pnand %p762_p2, %p756_p13 }
  0x42   :  { %766 = shalt.err (!%p763_p3)
}
  0x43   :  { %60 = dma.hbm_to_vmem [thread:$0]  %s1133_s3, 512, %s866_s17, [#allocation9], %s799_s27, %s799_s27, %s800_s28  }
  0x44   :  { %789 = dma.done.wait [#allocation3], 512  }
  0x45   :  { %790 = vsyncadd [#allocation3], 4294966784 }
  0x46   :  { %791 = dma.done.wait [#allocation6], 1024  }
  0x47   :  { %792 = vsyncadd [#allocation6], 4294966272 }
  0x48   :  { %793 = dma.done.wait [#allocation9], 512  }
  0x49   :  { %794 = vsyncadd [#allocation9], 4294966784  ;;  %v903_v0 = vld [vmem:[#allocation2] sm:$0xff]  ;;  %v905_v1 = vld [vmem:[#allocation2 + $0x8] sm:$0xff]  ;;  %s803_s3 = smov [#allocation10]  }
  0x4a   :  { %v907_v2 = vld [vmem:[#allocation2 + $0x10] sm:$0xff]  ;;  %v909_v3 = vld [vmem:[#allocation2 + $0x18] sm:$0xff]  ;;  %v911_v4 = vld [vmem:[#allocation5] sm:$0xff]  ;;  %s578_s12 = sshll.u32 %s803_s3, 4  ;;  %s579_s12 = int_to_ptr.vmem [resolvable:$true] %s578_s12 }
  0x4b   :  { %v913_v5 = vld [vmem:[#allocation5 + $0x8] sm:$0xff]  ;;  %v915_v6 = vld [vmem:[#allocation5 + $0x10] sm:$0xff]  ;;  %v917_v7 = vld [vmem:[#allocation5 + $0x18] sm:$0xff]  ;;  %v89_v8 = vmul.f32 %v911_v4, %v903_v0  ;;  %s767_s1 = scalar_lea.vmem %s579_s12, 512  ;;  %p772_p5 = scmp.lt.s32.totalorder %s579_s12, %s579_s12 }
  0x4c   :  { %v90_v9 = vmul.f32 %v913_v5, %v905_v1  ;;  %v91_v10 = vmul.f32 %v915_v6, %v907_v2  ;;  %v92_v11 = vmul.f32 %v917_v7, %v909_v3  ;;  %v929_v14 = vld [vmem:[#allocation7] sm:$0xff]  ;;  %v931_v15 = vld [vmem:[#allocation7 + $0x8] sm:$0xff]  ;;  %v935_v18 = vld [vmem:[#allocation7 + $0x10] sm:$0xff]  ;;  %p768_p4 = scmp.ne.s32.totalorder %s579_s12, %s767_s1  ;;  %p773_p6 = scmp.lt.s32.totalorder %s767_s1, %s767_s1 }
  0x4d   :  { %v93_v12 = vmul.f32 %v89_v8, %v903_v0  ;;  %v937_v19 = vld [vmem:[#allocation7 + $0x18] sm:$0xff]  ;;  %v948_v33 = vld [vmem:[#allocation8] sm:$0xff]  ;;  %v951_v35 = vld [vmem:[#allocation8 + $0x8] sm:$0xff] }
  0x4e   :  { %v94_v13 = vmul.f32 %v90_v9, %v905_v1  ;;  %v95_v16 = vmul.f32 %v91_v10, %v907_v2  ;;  %v96_v17 = vmul.f32 %v92_v11, %v909_v3  ;;  %v954_v37 = vld [vmem:[#allocation8 + $0x10] sm:$0xff]  ;;  %v957_v39 = vld [vmem:[#allocation8 + $0x18] sm:$0xff]  ;;  %p774_p7 = por %p773_p6, %p772_p5 }
  0x4f   :  { %v109_v20 = vmul.f32 3.0, %v93_v12  ;;  %v97_v26 = vadd.f32 %v93_v12, %v929_v14 }
  0x50   :  { %v110_v21 = vmul.f32 3.0, %v94_v13  ;;  %v111_v22 = vmul.f32 3.0, %v95_v16  ;;  %v112_v23 = vmul.f32 3.0, %v96_v17  ;;  %v98_v29 = vadd.f32 %v94_v13, %v931_v15  ;;  %p775_p8 = pnand %p774_p7, %p768_p4 }
  0x51   :  { %v113_v24 = vadd.f32 %v109_v20, %v929_v14  ;;  %v99_v30 = vadd.f32 %v95_v16, %v935_v18  ;;  %v100_v31 = vadd.f32 %v96_v17, %v937_v19  ;;  %v101_v32 = vmul.f32 %v97_v26, %v903_v0 }
  0x52   :  { %v114_v25 = vadd.f32 %v110_v21, %v931_v15  ;;  %v115_v27 = vadd.f32 %v111_v22, %v935_v18  ;;  %v116_v28 = vadd.f32 %v112_v23, %v937_v19  ;;  %v102_v34 = vmul.f32 %v98_v29, %v905_v1 }
  0x53   :  { %599 = vrcp.f32 %v113_v24  ;;  %v103_v36 = vmul.f32 %v99_v30, %v907_v2  ;;  %v104_v38 = vmul.f32 %v100_v31, %v909_v3  ;;  %v105_v40 = vadd.f32 %v101_v32, %v948_v33 }
  0x54   :  { %601 = vrcp.f32 %v114_v25  ;;  %v106_v41 = vadd.f32 %v102_v34, %v951_v35 }
  0x55   :  { %603 = vrcp.f32 %v115_v27  ;;  %v107_v42 = vadd.f32 %v103_v36, %v954_v37  ;;  %v108_v44 = vadd.f32 %v104_v38, %v957_v39  ;;  %vm129_vm0 = vcmp.ne.f32.partialorder %v105_v40, %v105_v40 }
  0x56   :  { %605 = vrcp.f32 %v116_v28  ;;  %vm130_vm1 = vcmp.ne.f32.partialorder %v106_v41, %v106_v41 }
  0x57   :  { %vm131_vm2 = vcmp.ne.f32.partialorder %v107_v42, %v107_v42  ;;  %vm132_vm3 = vcmp.ne.f32.partialorder %v108_v44, %v108_v44 }
  0x5d   :  { %v600_v43 = vpop.eup %599 }
  0x5e   :  { %v602_v45 = vpop.eup %601  ;;  %v121_v46 = vmul.f32 %v600_v43, %v105_v40 }
  0x5f   :  { %v604_v47 = vpop.eup %603  ;;  %v122_v48 = vmul.f32 %v602_v45, %v106_v41 }
  0x60   :  { %v606_v49 = vpop.eup %605  ;;  %v123_v50 = vmul.f32 %v604_v47, %v107_v42  ;;  %v125_v51 = vsub.f32 %v903_v0, %v121_v46 }
  0x61   :  { %v124_v52 = vmul.f32 %v606_v49, %v108_v44  ;;  %v126_v53 = vsub.f32 %v905_v1, %v122_v48 }
  0x62   :  { %v127_v54 = vsub.f32 %v907_v2, %v123_v50  ;;  %v133_v55 = vsel %vm129_vm0, %v903_v0, %v125_v51 }
  0x63   :  { %v128_v56 = vsub.f32 %v909_v3, %v124_v52  ;;  %v134_v57 = vsel %vm130_vm1, %v905_v1, %v126_v53  ;;  %v137_v58 = vmul.f32 %v133_v55, %v911_v4 }
  0x64   :  { %v135_v59 = vsel %vm131_vm2, %v907_v2, %v127_v54  ;;  %v138_v60 = vmul.f32 %v134_v57, %v913_v5 }
  0x65   :  { %v136_v61 = vsel %vm132_vm3, %v909_v3, %v128_v56  ;;  %v139_v62 = vmul.f32 %v135_v59, %v915_v6  ;;  %v141_v63 = vmul.f32 %v137_v58, %v133_v55 }
  0x66   :  { %v140_v8 = vmul.f32 %v136_v61, %v917_v7  ;;  %v142_v9 = vmul.f32 %v138_v60, %v134_v57 }
  0x67   :  { %v143_v10 = vmul.f32 %v139_v62, %v135_v59  ;;  %v157_v0 = vmul.f32 3.0, %v141_v63  ;;  %v145_v16 = vadd.f32 %v141_v63, %v929_v14 }
  0x68   :  { %v144_v11 = vmul.f32 %v140_v8, %v136_v61  ;;  %v158_v12 = vmul.f32 3.0, %v142_v9  ;;  %v146_v3 = vadd.f32 %v142_v9, %v931_v15 }
  0x69   :  { %v159_v13 = vmul.f32 3.0, %v143_v10  ;;  %v161_v1 = vadd.f32 %v157_v0, %v929_v14  ;;  %v147_v21 = vadd.f32 %v143_v10, %v935_v18  ;;  %v149_v24 = vmul.f32 %v145_v16, %v133_v55 }
  0x6a   :  { %v160_v2 = vmul.f32 3.0, %v144_v11  ;;  %v162_v17 = vadd.f32 %v158_v12, %v931_v15  ;;  %v148_v23 = vadd.f32 %v144_v11, %v937_v19  ;;  %v150_v25 = vmul.f32 %v146_v3, %v134_v57 }
  0x6b   :  { %v163_v20 = vadd.f32 %v159_v13, %v935_v18  ;;  %607 = vrcp.f32 %v161_v1  ;;  %v151_v26 = vmul.f32 %v147_v21, %v135_v59  ;;  %v153_v28 = vadd.f32 %v149_v24, %v948_v33 }
  0x6c   :  { %v164_v22 = vadd.f32 %v160_v2, %v937_v19  ;;  %609 = vrcp.f32 %v162_v17  ;;  %v152_v27 = vmul.f32 %v148_v23, %v136_v61  ;;  %v154_v29 = vadd.f32 %v150_v25, %v951_v35 }
  0x6d   :  { %611 = vrcp.f32 %v163_v20  ;;  %v155_v30 = vadd.f32 %v151_v26, %v954_v37  ;;  %vm177_vm4 = vcmp.ne.f32.partialorder %v153_v28, %v153_v28 }
  0x6e   :  { %613 = vrcp.f32 %v164_v22  ;;  %v156_v32 = vadd.f32 %v152_v27, %v957_v39  ;;  %vm178_vm5 = vcmp.ne.f32.partialorder %v154_v29, %v154_v29 }
  0x6f   :  { %vm179_vm6 = vcmp.ne.f32.partialorder %v155_v30, %v155_v30 }
  0x70   :  { %vm180_vm7 = vcmp.ne.f32.partialorder %v156_v32, %v156_v32 }
  0x75   :  { %v608_v31 = vpop.eup %607 }
  0x76   :  { %v610_v34 = vpop.eup %609  ;;  %v169_v36 = vmul.f32 %v608_v31, %v153_v28 }
  0x77   :  { %v612_v38 = vpop.eup %611  ;;  %v170_v40 = vmul.f32 %v610_v34, %v154_v29 }
  0x78   :  { %v614_v41 = vpop.eup %613  ;;  %v171_v42 = vmul.f32 %v612_v38, %v155_v30  ;;  %v173_v43 = vsub.f32 %v133_v55, %v169_v36 }
  0x79   :  { %v172_v44 = vmul.f32 %v614_v41, %v156_v32  ;;  %v174_v45 = vsub.f32 %v134_v57, %v170_v40 }
  0x7a   :  { %v175_v46 = vsub.f32 %v135_v59, %v171_v42  ;;  %v181_v47 = vsel %vm177_vm4, %v133_v55, %v173_v43 }
  0x7b   :  { %v176_v48 = vsub.f32 %v136_v61, %v172_v44  ;;  %v182_v49 = vsel %vm178_vm5, %v134_v57, %v174_v45  ;;  %v185_v50 = vmul.f32 %v181_v47, %v911_v4 }
  0x7c   :  { %v183_v51 = vsel %vm179_vm6, %v135_v59, %v175_v46  ;;  %v186_v52 = vmul.f32 %v182_v49, %v913_v5 }
  0x7d   :  { %v184_v53 = vsel %vm180_vm7, %v136_v61, %v176_v48  ;;  %v187_v54 = vmul.f32 %v183_v51, %v915_v6  ;;  %v189_v56 = vmul.f32 %v185_v50, %v181_v47 }
  0x7e   :  { %v188_v58 = vmul.f32 %v184_v53, %v917_v7  ;;  %v190_v60 = vmul.f32 %v186_v52, %v182_v49 }
  0x7f   :  { %v191_v62 = vmul.f32 %v187_v54, %v183_v51  ;;  %v205_v63 = vmul.f32 3.0, %v189_v56  ;;  %v193_v57 = vadd.f32 %v189_v56, %v929_v14 }
  0x80   :  { %v192_v8 = vmul.f32 %v188_v58, %v184_v53  ;;  %v206_v9 = vmul.f32 3.0, %v190_v60  ;;  %v194_v61 = vadd.f32 %v190_v60, %v931_v15 }
  0x81   :  { %v207_v10 = vmul.f32 3.0, %v191_v62  ;;  %v209_v55 = vadd.f32 %v205_v63, %v929_v14  ;;  %v195_v12 = vadd.f32 %v191_v62, %v935_v18  ;;  %v197_v16 = vmul.f32 %v193_v57, %v181_v47 }
  0x82   :  { %v208_v0 = vmul.f32 3.0, %v192_v8  ;;  %v210_v59 = vadd.f32 %v206_v9, %v931_v15  ;;  %v196_v1 = vadd.f32 %v192_v8, %v937_v19  ;;  %v198_v2 = vmul.f32 %v194_v61, %v182_v49 }
  0x83   :  { %v211_v11 = vadd.f32 %v207_v10, %v935_v18  ;;  %615 = vrcp.f32 %v209_v55  ;;  %v199_v17 = vmul.f32 %v195_v12, %v183_v51  ;;  %v201_v20 = vadd.f32 %v197_v16, %v948_v33 }
  0x84   :  { %v212_v13 = vadd.f32 %v208_v0, %v937_v19  ;;  %617 = vrcp.f32 %v210_v59  ;;  %v200_v3 = vmul.f32 %v196_v1, %v184_v53  ;;  %v202_v21 = vadd.f32 %v198_v2, %v951_v35 }
  0x85   :  { %619 = vrcp.f32 %v211_v11  ;;  %v203_v22 = vadd.f32 %v199_v17, %v954_v37  ;;  %vm225_vm8 = vcmp.ne.f32.partialorder %v201_v20, %v201_v20 }
  0x86   :  { %621 = vrcp.f32 %v212_v13  ;;  %v204_v24 = vadd.f32 %v200_v3, %v957_v39  ;;  %vm226_vm9 = vcmp.ne.f32.partialorder %v202_v21, %v202_v21 }
  0x87   :  { %vm227_vm10 = vcmp.ne.f32.partialorder %v203_v22, %v203_v22 }
  0x88   :  { %vm228_vm11 = vcmp.ne.f32.partialorder %v204_v24, %v204_v24 }
  0x8d   :  { %v616_v23 = vpop.eup %615 }
  0x8e   :  { %v618_v25 = vpop.eup %617  ;;  %v217_v26 = vmul.f32 %v616_v23, %v201_v20 }
  0x8f   :  { %v620_v27 = vpop.eup %619  ;;  %v218_v28 = vmul.f32 %v618_v25, %v202_v21 }
  0x90   :  { %v622_v29 = vpop.eup %621  ;;  %v219_v30 = vmul.f32 %v620_v27, %v203_v22  ;;  %v221_v31 = vsub.f32 %v181_v47, %v217_v26 }
  0x91   :  { %v220_v32 = vmul.f32 %v622_v29, %v204_v24  ;;  %v222_v34 = vsub.f32 %v182_v49, %v218_v28 }
  0x92   :  { %v223_v36 = vsub.f32 %v183_v51, %v219_v30  ;;  %v229_v38 = vsel %vm225_vm8, %v181_v47, %v221_v31 }
  0x93   :  { %v224_v40 = vsub.f32 %v184_v53, %v220_v32  ;;  %v230_v41 = vsel %vm226_vm9, %v182_v49, %v222_v34  ;;  %v233_v42 = vmul.f32 %v229_v38, %v911_v4 }
  0x94   :  { %v231_v43 = vsel %vm227_vm10, %v183_v51, %v223_v36  ;;  %v234_v44 = vmul.f32 %v230_v41, %v913_v5 }
  0x95   :  { %v232_v45 = vsel %vm228_vm11, %v184_v53, %v224_v40  ;;  %v235_v46 = vmul.f32 %v231_v43, %v915_v6  ;;  %v237_v48 = vmul.f32 %v233_v42, %v229_v38 }
  0x96   :  { %v236_v50 = vmul.f32 %v232_v45, %v917_v7  ;;  %v238_v52 = vmul.f32 %v234_v44, %v230_v41 }
  0x97   :  { %v239_v54 = vmul.f32 %v235_v46, %v231_v43  ;;  %v253_v56 = vmul.f32 3.0, %v237_v48  ;;  %v241_v49 = vadd.f32 %v237_v48, %v929_v14 }
  0x98   :  { %v240_v58 = vmul.f32 %v236_v50, %v232_v45  ;;  %v254_v60 = vmul.f32 3.0, %v238_v52  ;;  %v242_v53 = vadd.f32 %v238_v52, %v931_v15 }
  0x99   :  { %v255_v62 = vmul.f32 3.0, %v239_v54  ;;  %v257_v47 = vadd.f32 %v253_v56, %v929_v14  ;;  %v243_v9 = vadd.f32 %v239_v54, %v935_v18  ;;  %v245_v57 = vmul.f32 %v241_v49, %v229_v38 }
  0x9a   :  { %v256_v63 = vmul.f32 3.0, %v240_v58  ;;  %v258_v51 = vadd.f32 %v254_v60, %v931_v15  ;;  %v244_v55 = vadd.f32 %v240_v58, %v937_v19  ;;  %v246_v0 = vmul.f32 %v242_v53, %v230_v41 }
  0x9b   :  { %v259_v8 = vadd.f32 %v255_v62, %v935_v18  ;;  %623 = vrcp.f32 %v257_v47  ;;  %v247_v59 = vmul.f32 %v243_v9, %v231_v43  ;;  %v249_v11 = vadd.f32 %v245_v57, %v948_v33 }
  0x9c   :  { %v260_v10 = vadd.f32 %v256_v63, %v937_v19  ;;  %625 = vrcp.f32 %v258_v51  ;;  %v248_v61 = vmul.f32 %v244_v55, %v232_v45  ;;  %v250_v12 = vadd.f32 %v246_v0, %v951_v35 }
  0x9d   :  { %627 = vrcp.f32 %v259_v8  ;;  %v251_v13 = vadd.f32 %v247_v59, %v954_v37  ;;  %vm273_vm12 = vcmp.ne.f32.partialorder %v249_v11, %v249_v11 }
  0x9e   :  { %629 = vrcp.f32 %v260_v10  ;;  %v252_v16 = vadd.f32 %v248_v61, %v957_v39  ;;  %vm274_vm13 = vcmp.ne.f32.partialorder %v250_v12, %v250_v12 }
  0x9f   :  { %vm275_vm14 = vcmp.ne.f32.partialorder %v251_v13, %v251_v13 }
  0xa0   :  { %vm276_vm15 = vcmp.ne.f32.partialorder %v252_v16, %v252_v16 }
  0xa5   :  { %v624_v1 = vpop.eup %623 }
  0xa6   :  { %v626_v2 = vpop.eup %625  ;;  %v265_v17 = vmul.f32 %v624_v1, %v249_v11 }
  0xa7   :  { %v628_v3 = vpop.eup %627  ;;  %v266_v20 = vmul.f32 %v626_v2, %v250_v12 }
  0xa8   :  { %v630_v21 = vpop.eup %629  ;;  %v267_v22 = vmul.f32 %v628_v3, %v251_v13  ;;  %v269_v23 = vsub.f32 %v229_v38, %v265_v17 }
  0xa9   :  { %v268_v24 = vmul.f32 %v630_v21, %v252_v16  ;;  %v270_v25 = vsub.f32 %v230_v41, %v266_v20 }
  0xaa   :  { %v271_v26 = vsub.f32 %v231_v43, %v267_v22  ;;  %v277_v27 = vsel %vm273_vm12, %v229_v38, %v269_v23 }
  0xab   :  { %v272_v28 = vsub.f32 %v232_v45, %v268_v24  ;;  %v278_v29 = vsel %vm274_vm13, %v230_v41, %v270_v25  ;;  %v281_v30 = vmul.f32 %v277_v27, %v911_v4 }
  0xac   :  { %v279_v31 = vsel %vm275_vm14, %v231_v43, %v271_v26  ;;  %v282_v32 = vmul.f32 %v278_v29, %v913_v5 }
  0xad   :  { %v280_v34 = vsel %vm276_vm15, %v232_v45, %v272_v28  ;;  %v283_v36 = vmul.f32 %v279_v31, %v915_v6  ;;  %v285_v40 = vmul.f32 %v281_v30, %v277_v27 }
  0xae   :  { %v284_v42 = vmul.f32 %v280_v34, %v917_v7  ;;  %v286_v44 = vmul.f32 %v282_v32, %v278_v29 }
  0xaf   :  { %v287_v46 = vmul.f32 %v283_v36, %v279_v31  ;;  %v301_v48 = vmul.f32 3.0, %v285_v40  ;;  %v289_v41 = vadd.f32 %v285_v40, %v929_v14 }
  0xb0   :  { %v288_v50 = vmul.f32 %v284_v42, %v280_v34  ;;  %v302_v52 = vmul.f32 3.0, %v286_v44  ;;  %v290_v45 = vadd.f32 %v286_v44, %v931_v15 }
  0xb1   :  { %v303_v54 = vmul.f32 3.0, %v287_v46  ;;  %v305_v38 = vadd.f32 %v301_v48, %v929_v14  ;;  %v291_v60 = vadd.f32 %v287_v46, %v935_v18  ;;  %v293_v49 = vmul.f32 %v289_v41, %v277_v27 }
  0xb2   :  { %v304_v56 = vmul.f32 3.0, %v288_v50  ;;  %v306_v43 = vadd.f32 %v302_v52, %v931_v15  ;;  %v292_v47 = vadd.f32 %v288_v50, %v937_v19  ;;  %v294_v63 = vmul.f32 %v290_v45, %v278_v29 }
  0xb3   :  { %v307_v58 = vadd.f32 %v303_v54, %v935_v18  ;;  %631 = vrcp.f32 %v305_v38  ;;  %v295_v51 = vmul.f32 %v291_v60, %v279_v31  ;;  %v297_v8 = vadd.f32 %v293_v49, %v948_v33 }
  0xb4   :  { %v308_v62 = vadd.f32 %v304_v56, %v937_v19  ;;  %633 = vrcp.f32 %v306_v43  ;;  %v296_v53 = vmul.f32 %v292_v47, %v280_v34  ;;  %v298_v9 = vadd.f32 %v294_v63, %v951_v35 }
  0xb5   :  { %635 = vrcp.f32 %v307_v58  ;;  %v299_v10 = vadd.f32 %v295_v51, %v954_v37  ;;  %vm321_vm0 = vcmp.ne.f32.partialorder %v297_v8, %v297_v8 }
  0xb6   :  { %637 = vrcp.f32 %v308_v62  ;;  %v300_v57 = vadd.f32 %v296_v53, %v957_v39  ;;  %vm322_vm1 = vcmp.ne.f32.partialorder %v298_v9, %v298_v9 }
  0xb7   :  { %vm323_vm2 = vcmp.ne.f32.partialorder %v299_v10, %v299_v10 }
  0xb8   :  { %vm324_vm3 = vcmp.ne.f32.partialorder %v300_v57, %v300_v57 }
  0xbd   :  { %v632_v55 = vpop.eup %631 }
  0xbe   :  { %v634_v0 = vpop.eup %633  ;;  %v313_v59 = vmul.f32 %v632_v55, %v297_v8 }
  0xbf   :  { %v636_v61 = vpop.eup %635  ;;  %v314_v11 = vmul.f32 %v634_v0, %v298_v9 }
  0xc0   :  { %v638_v12 = vpop.eup %637  ;;  %v315_v13 = vmul.f32 %v636_v61, %v299_v10  ;;  %v317_v1 = vsub.f32 %v277_v27, %v313_v59 }
  0xc1   :  { %v316_v16 = vmul.f32 %v638_v12, %v300_v57  ;;  %v318_v2 = vsub.f32 %v278_v29, %v314_v11 }
  0xc2   :  { %v319_v17 = vsub.f32 %v279_v31, %v315_v13  ;;  %v325_v3 = vsel %vm321_vm0, %v277_v27, %v317_v1 }
  0xc3   :  { %v320_v20 = vsub.f32 %v280_v34, %v316_v16  ;;  %v326_v21 = vsel %vm322_vm1, %v278_v29, %v318_v2  ;;  %v329_v22 = vmul.f32 %v325_v3, %v911_v4 }
  0xc4   :  { %v327_v23 = vsel %vm323_vm2, %v279_v31, %v319_v17  ;;  %v330_v24 = vmul.f32 %v326_v21, %v913_v5 }
  0xc5   :  { %v328_v25 = vsel %vm324_vm3, %v280_v34, %v320_v20  ;;  %v331_v26 = vmul.f32 %v327_v23, %v915_v6  ;;  %v333_v28 = vmul.f32 %v329_v22, %v325_v3 }
  0xc6   :  { %v332_v30 = vmul.f32 %v328_v25, %v917_v7  ;;  %v334_v32 = vmul.f32 %v330_v24, %v326_v21 }
  0xc7   :  { %v335_v36 = vmul.f32 %v331_v26, %v327_v23  ;;  %v349_v40 = vmul.f32 3.0, %v333_v28  ;;  %v337_v29 = vadd.f32 %v333_v28, %v929_v14 }
  0xc8   :  { %v336_v42 = vmul.f32 %v332_v30, %v328_v25  ;;  %v350_v44 = vmul.f32 3.0, %v334_v32  ;;  %v338_v34 = vadd.f32 %v334_v32, %v931_v15 }
  0xc9   :  { %v351_v46 = vmul.f32 3.0, %v335_v36  ;;  %v353_v27 = vadd.f32 %v349_v40, %v929_v14  ;;  %v339_v52 = vadd.f32 %v335_v36, %v935_v18  ;;  %v341_v41 = vmul.f32 %v337_v29, %v325_v3 }
  0xca   :  { %v352_v48 = vmul.f32 3.0, %v336_v42  ;;  %v354_v31 = vadd.f32 %v350_v44, %v931_v15  ;;  %v340_v38 = vadd.f32 %v336_v42, %v937_v19  ;;  %v342_v56 = vmul.f32 %v338_v34, %v326_v21 }
  0xcb   :  { %v355_v50 = vadd.f32 %v351_v46, %v935_v18  ;;  %639 = vrcp.f32 %v353_v27  ;;  %v343_v43 = vmul.f32 %v339_v52, %v327_v23  ;;  %v345_v58 = vadd.f32 %v341_v41, %v948_v33 }
  0xcc   :  { %v356_v54 = vadd.f32 %v352_v48, %v937_v19  ;;  %641 = vrcp.f32 %v354_v31  ;;  %v344_v45 = vmul.f32 %v340_v38, %v328_v25  ;;  %v346_v60 = vadd.f32 %v342_v56, %v951_v35 }
  0xcd   :  { %643 = vrcp.f32 %v355_v50  ;;  %v347_v62 = vadd.f32 %v343_v43, %v954_v37  ;;  %vm369_vm4 = vcmp.ne.f32.partialorder %v345_v58, %v345_v58 }
  0xce   :  { %645 = vrcp.f32 %v356_v54  ;;  %v348_v49 = vadd.f32 %v344_v45, %v957_v39  ;;  %vm370_vm5 = vcmp.ne.f32.partialorder %v346_v60, %v346_v60 }
  0xcf   :  { %vm371_vm6 = vcmp.ne.f32.partialorder %v347_v62, %v347_v62 }
  0xd0   :  { %vm372_vm7 = vcmp.ne.f32.partialorder %v348_v49, %v348_v49 }
  0xd5   :  { %v640_v47 = vpop.eup %639 }
  0xd6   :  { %v642_v63 = vpop.eup %641  ;;  %v361_v51 = vmul.f32 %v640_v47, %v345_v58 }
  0xd7   :  { %v644_v53 = vpop.eup %643  ;;  %v362_v8 = vmul.f32 %v642_v63, %v346_v60 }
  0xd8   :  { %v646_v9 = vpop.eup %645  ;;  %v363_v10 = vmul.f32 %v644_v53, %v347_v62  ;;  %v365_v55 = vsub.f32 %v325_v3, %v361_v51 }
  0xd9   :  { %v364_v57 = vmul.f32 %v646_v9, %v348_v49  ;;  %v366_v0 = vsub.f32 %v326_v21, %v362_v8 }
  0xda   :  { %v367_v59 = vsub.f32 %v327_v23, %v363_v10  ;;  %v373_v61 = vsel %vm369_vm4, %v325_v3, %v365_v55 }
  0xdb   :  { %v368_v11 = vsub.f32 %v328_v25, %v364_v57  ;;  %v374_v12 = vsel %vm370_vm5, %v326_v21, %v366_v0  ;;  %v377_v13 = vmul.f32 %v373_v61, %v911_v4 }
  0xdc   :  { %v375_v1 = vsel %vm371_vm6, %v327_v23, %v367_v59  ;;  %v378_v16 = vmul.f32 %v374_v12, %v913_v5 }
  0xdd   :  { %v376_v2 = vsel %vm372_vm7, %v328_v25, %v368_v11  ;;  %v379_v17 = vmul.f32 %v375_v1, %v915_v6  ;;  %v381_v20 = vmul.f32 %v377_v13, %v373_v61 }
  0xde   :  { %v380_v22 = vmul.f32 %v376_v2, %v917_v7  ;;  %v382_v24 = vmul.f32 %v378_v16, %v374_v12 }
  0xdf   :  { %v383_v26 = vmul.f32 %v379_v17, %v375_v1  ;;  %v397_v28 = vmul.f32 3.0, %v381_v20  ;;  %v385_v21 = vadd.f32 %v381_v20, %v929_v14 }
  0xe0   :  { %v384_v30 = vmul.f32 %v380_v22, %v376_v2  ;;  %v398_v32 = vmul.f32 3.0, %v382_v24  ;;  %v386_v25 = vadd.f32 %v382_v24, %v931_v15 }
  0xe1   :  { %v399_v36 = vmul.f32 3.0, %v383_v26  ;;  %v401_v3 = vadd.f32 %v397_v28, %v929_v14  ;;  %v387_v44 = vadd.f32 %v383_v26, %v935_v18  ;;  %v389_v29 = vmul.f32 %v385_v21, %v373_v61 }
  0xe2   :  { %v400_v40 = vmul.f32 3.0, %v384_v30  ;;  %v402_v23 = vadd.f32 %v398_v32, %v931_v15  ;;  %v388_v27 = vadd.f32 %v384_v30, %v937_v19  ;;  %v390_v48 = vmul.f32 %v386_v25, %v374_v12 }
  0xe3   :  { %v403_v42 = vadd.f32 %v399_v36, %v935_v18  ;;  %647 = vrcp.f32 %v401_v3  ;;  %v391_v31 = vmul.f32 %v387_v44, %v375_v1  ;;  %v393_v50 = vadd.f32 %v389_v29, %v948_v33 }
  0xe4   :  { %v404_v46 = vadd.f32 %v400_v40, %v937_v19  ;;  %649 = vrcp.f32 %v402_v23  ;;  %v392_v34 = vmul.f32 %v388_v27, %v376_v2  ;;  %v394_v52 = vadd.f32 %v390_v48, %v951_v35 }
  0xe5   :  { %651 = vrcp.f32 %v403_v42  ;;  %v395_v54 = vadd.f32 %v391_v31, %v954_v37  ;;  %vm417_vm8 = vcmp.ne.f32.partialorder %v393_v50, %v393_v50 }
  0xe6   :  { %653 = vrcp.f32 %v404_v46  ;;  %v396_v41 = vadd.f32 %v392_v34, %v957_v39  ;;  %vm418_vm9 = vcmp.ne.f32.partialorder %v394_v52, %v394_v52 }
  0xe7   :  { %vm419_vm10 = vcmp.ne.f32.partialorder %v395_v54, %v395_v54 }
  0xe8   :  { %vm420_vm11 = vcmp.ne.f32.partialorder %v396_v41, %v396_v41 }
  0xed   :  { %v648_v38 = vpop.eup %647 }
  0xee   :  { %v650_v56 = vpop.eup %649  ;;  %v409_v43 = vmul.f32 %v648_v38, %v393_v50 }
  0xef   :  { %v652_v45 = vpop.eup %651  ;;  %v410_v58 = vmul.f32 %v650_v56, %v394_v52 }
  0xf0   :  { %v654_v60 = vpop.eup %653  ;;  %v411_v62 = vmul.f32 %v652_v45, %v395_v54  ;;  %v413_v47 = vsub.f32 %v373_v61, %v409_v43 }
  0xf1   :  { %v412_v49 = vmul.f32 %v654_v60, %v396_v41  ;;  %v414_v63 = vsub.f32 %v374_v12, %v410_v58 }
  0xf2   :  { %v415_v51 = vsub.f32 %v375_v1, %v411_v62  ;;  %v421_v53 = vsel %vm417_vm8, %v373_v61, %v413_v47 }
  0xf3   :  { %v416_v8 = vsub.f32 %v376_v2, %v412_v49  ;;  %v422_v9 = vsel %vm418_vm9, %v374_v12, %v414_v63  ;;  %v425_v10 = vmul.f32 %v421_v53, %v911_v4 }
  0xf4   :  { %v423_v55 = vsel %vm419_vm10, %v375_v1, %v415_v51  ;;  %v426_v57 = vmul.f32 %v422_v9, %v913_v5 }
  0xf5   :  { %v424_v0 = vsel %vm420_vm11, %v376_v2, %v416_v8  ;;  %v427_v59 = vmul.f32 %v423_v55, %v915_v6  ;;  %v429_v11 = vmul.f32 %v425_v10, %v421_v53 }
  0xf6   :  { %v428_v13 = vmul.f32 %v424_v0, %v917_v7  ;;  %v430_v16 = vmul.f32 %v426_v57, %v422_v9 }
  0xf7   :  { %v431_v17 = vmul.f32 %v427_v59, %v423_v55  ;;  %v445_v20 = vmul.f32 3.0, %v429_v11  ;;  %v433_v12 = vadd.f32 %v429_v11, %v929_v14 }
  0xf8   :  { %v432_v22 = vmul.f32 %v428_v13, %v424_v0  ;;  %v446_v24 = vmul.f32 3.0, %v430_v16  ;;  %v434_v2 = vadd.f32 %v430_v16, %v931_v15 }
  0xf9   :  { %v447_v26 = vmul.f32 3.0, %v431_v17  ;;  %v449_v61 = vadd.f32 %v445_v20, %v929_v14  ;;  %v435_v32 = vadd.f32 %v431_v17, %v935_v18  ;;  %v437_v21 = vmul.f32 %v433_v12, %v421_v53 }
  0xfa   :  { %v448_v28 = vmul.f32 3.0, %v432_v22  ;;  %v450_v1 = vadd.f32 %v446_v24, %v931_v15  ;;  %v436_v3 = vadd.f32 %v432_v22, %v937_v19  ;;  %v438_v40 = vmul.f32 %v434_v2, %v422_v9 }
  0xfb   :  { %v451_v30 = vadd.f32 %v447_v26, %v935_v18  ;;  %655 = vrcp.f32 %v449_v61  ;;  %v439_v23 = vmul.f32 %v435_v32, %v423_v55  ;;  %v441_v42 = vadd.f32 %v437_v21, %v948_v33 }
  0xfc   :  { %v452_v36 = vadd.f32 %v448_v28, %v937_v19  ;;  %657 = vrcp.f32 %v450_v1  ;;  %v440_v25 = vmul.f32 %v436_v3, %v424_v0  ;;  %v442_v44 = vadd.f32 %v438_v40, %v951_v35 }
  0xfd   :  { %659 = vrcp.f32 %v451_v30  ;;  %v443_v46 = vadd.f32 %v439_v23, %v954_v37  ;;  %vm465_vm12 = vcmp.ne.f32.partialorder %v441_v42, %v441_v42 }
  0xfe   :  { %661 = vrcp.f32 %v452_v36  ;;  %v444_v29 = vadd.f32 %v440_v25, %v957_v39  ;;  %vm466_vm13 = vcmp.ne.f32.partialorder %v442_v44, %v442_v44 }
  0xff   :  { %vm467_vm14 = vcmp.ne.f32.partialorder %v443_v46, %v443_v46 }
 0x100   :  { %vm468_vm15 = vcmp.ne.f32.partialorder %v444_v29, %v444_v29 }
 0x105   :  { %v656_v27 = vpop.eup %655 }
 0x106   :  { %v658_v48 = vpop.eup %657  ;;  %v457_v31 = vmul.f32 %v656_v27, %v441_v42 }
 0x107   :  { %v660_v34 = vpop.eup %659  ;;  %v458_v50 = vmul.f32 %v658_v48, %v442_v44 }
 0x108   :  { %v662_v52 = vpop.eup %661  ;;  %v459_v54 = vmul.f32 %v660_v34, %v443_v46  ;;  %v461_v38 = vsub.f32 %v421_v53, %v457_v31 }
 0x109   :  { %v460_v41 = vmul.f32 %v662_v52, %v444_v29  ;;  %v462_v56 = vsub.f32 %v422_v9, %v458_v50 }
 0x10a   :  { %v463_v43 = vsub.f32 %v423_v55, %v459_v54  ;;  %v469_v45 = vsel %vm465_vm12, %v421_v53, %v461_v38 }
 0x10b   :  { %v464_v58 = vsub.f32 %v424_v0, %v460_v41  ;;  %v470_v60 = vsel %vm466_vm13, %v422_v9, %v462_v56  ;;  %v473_v62 = vmul.f32 %v469_v45, %v911_v4 }
 0x10c   :  { %v471_v47 = vsel %vm467_vm14, %v423_v55, %v463_v43  ;;  %v474_v49 = vmul.f32 %v470_v60, %v913_v5 }
 0x10d   :  { %v472_v63 = vsel %vm468_vm15, %v424_v0, %v464_v58  ;;  %v475_v51 = vmul.f32 %v471_v47, %v915_v6  ;;  %v477_v8 = vmul.f32 %v473_v62, %v469_v45 }
 0x10e   :  { %v476_v10 = vmul.f32 %v472_v63, %v917_v7  ;;  %v478_v57 = vmul.f32 %v474_v49, %v470_v60 }
 0x10f   :  { %v479_v59 = vmul.f32 %v475_v51, %v471_v47  ;;  %v493_v11 = vmul.f32 3.0, %v477_v8  ;;  %v481_v9 = vadd.f32 %v477_v8, %v929_v14 }
 0x110   :  { %v480_v13 = vmul.f32 %v476_v10, %v472_v63  ;;  %v494_v16 = vmul.f32 3.0, %v478_v57  ;;  %v482_v0 = vadd.f32 %v478_v57, %v931_v15 }
 0x111   :  { %v495_v17 = vmul.f32 3.0, %v479_v59  ;;  %v497_v53 = vadd.f32 %v493_v11, %v929_v14  ;;  %v483_v24 = vadd.f32 %v479_v59, %v935_v18  ;;  %v485_v12 = vmul.f32 %v481_v9, %v469_v45 }
 0x112   :  { %v496_v20 = vmul.f32 3.0, %v480_v13  ;;  %v498_v55 = vadd.f32 %v494_v16, %v931_v15  ;;  %v484_v61 = vadd.f32 %v480_v13, %v937_v19  ;;  %v486_v28 = vmul.f32 %v482_v0, %v470_v60 }
 0x113   :  { %v499_v22 = vadd.f32 %v495_v17, %v935_v18  ;;  %663 = vrcp.f32 %v497_v53  ;;  %v487_v1 = vmul.f32 %v483_v24, %v471_v47  ;;  %v489_v30 = vadd.f32 %v485_v12, %v948_v33 }
 0x114   :  { %v500_v26 = vadd.f32 %v496_v20, %v937_v19  ;;  %665 = vrcp.f32 %v498_v55  ;;  %v488_v2 = vmul.f32 %v484_v61, %v472_v63  ;;  %v490_v32 = vadd.f32 %v486_v28, %v951_v35 }
 0x115   :  { %667 = vrcp.f32 %v499_v22  ;;  %v491_v36 = vadd.f32 %v487_v1, %v954_v37  ;;  %vm513_vm0 = vcmp.ne.f32.partialorder %v489_v30, %v489_v30 }
 0x116   :  { %669 = vrcp.f32 %v500_v26  ;;  %v492_v21 = vadd.f32 %v488_v2, %v957_v39  ;;  %vm514_vm1 = vcmp.ne.f32.partialorder %v490_v32, %v490_v32 }
 0x117   :  { %vm515_vm2 = vcmp.ne.f32.partialorder %v491_v36, %v491_v36 }
 0x118   :  { %vm516_vm3 = vcmp.ne.f32.partialorder %v492_v21, %v492_v21 }
 0x11d   :  { %v664_v3 = vpop.eup %663 }
 0x11e   :  { %v666_v40 = vpop.eup %665  ;;  %v505_v23 = vmul.f32 %v664_v3, %v489_v30 }
 0x11f   :  { %v668_v25 = vpop.eup %667  ;;  %v506_v42 = vmul.f32 %v666_v40, %v490_v32 }
 0x120   :  { %v670_v44 = vpop.eup %669  ;;  %v507_v46 = vmul.f32 %v668_v25, %v491_v36  ;;  %v509_v27 = vsub.f32 %v469_v45, %v505_v23 }
 0x121   :  { %v508_v29 = vmul.f32 %v670_v44, %v492_v21  ;;  %v510_v48 = vsub.f32 %v470_v60, %v506_v42 }
 0x122   :  { %v511_v31 = vsub.f32 %v471_v47, %v507_v46  ;;  %v517_v34 = vsel %vm513_vm0, %v469_v45, %v509_v27 }
 0x123   :  { %v512_v50 = vsub.f32 %v472_v63, %v508_v29  ;;  %v518_v52 = vsel %vm514_vm1, %v470_v60, %v510_v48  ;;  %v521_v54 = vmul.f32 %v517_v34, %v911_v4 }
 0x124   :  { %v519_v38 = vsel %vm515_vm2, %v471_v47, %v511_v31  ;;  %v522_v41 = vmul.f32 %v518_v52, %v913_v5 }
 0x125   :  { %v520_v56 = vsel %vm516_vm3, %v472_v63, %v512_v50  ;;  %v523_v43 = vmul.f32 %v519_v38, %v915_v6  ;;  %v525_v58 = vmul.f32 %v521_v54, %v517_v34 }
 0x126   :  { %v524_v62 = vmul.f32 %v520_v56, %v917_v7  ;;  %v526_v49 = vmul.f32 %v522_v41, %v518_v52 }
 0x127   :  { %v527_v51 = vmul.f32 %v523_v43, %v519_v38  ;;  %v541_v8 = vmul.f32 3.0, %v525_v58  ;;  %v529_v60 = vadd.f32 %v525_v58, %v929_v14 }
 0x128   :  { %v528_v10 = vmul.f32 %v524_v62, %v520_v56  ;;  %v542_v57 = vmul.f32 3.0, %v526_v49  ;;  %v530_v5 = vadd.f32 %v526_v49, %v931_v15 }
 0x129   :  { %v543_v59 = vmul.f32 3.0, %v527_v51  ;;  %v545_v45 = vadd.f32 %v541_v8, %v929_v14  ;;  %v531_v7 = vadd.f32 %v527_v51, %v935_v18  ;;  %v533_v13 = vmul.f32 %v529_v60, %v517_v34 }
 0x12a   :  { %v544_v4 = vmul.f32 3.0, %v528_v10  ;;  %v546_v47 = vadd.f32 %v542_v57, %v931_v15  ;;  %v532_v11 = vadd.f32 %v528_v10, %v937_v19  ;;  %v534_v16 = vmul.f32 %v530_v5, %v518_v52 }
 0x12b   :  { %v547_v6 = vadd.f32 %v543_v59, %v935_v18  ;;  %671 = vrcp.f32 %v545_v45  ;;  %v535_v14 = vmul.f32 %v531_v7, %v519_v38  ;;  %v537_v53 = vadd.f32 %v533_v13, %v948_v33 }
 0x12c   :  { %v548_v63 = vadd.f32 %v544_v4, %v937_v19  ;;  %673 = vrcp.f32 %v546_v47  ;;  %v536_v17 = vmul.f32 %v532_v11, %v520_v56  ;;  %v538_v15 = vadd.f32 %v534_v16, %v951_v35 }
 0x12d   :  { %675 = vrcp.f32 %v547_v6  ;;  %v539_v9 = vadd.f32 %v535_v14, %v954_v37  ;;  %vm561_vm4 = vcmp.ne.f32.partialorder %v537_v53, %v537_v53 }
 0x12e   :  { %677 = vrcp.f32 %v548_v63  ;;  %v540_v18 = vadd.f32 %v536_v17, %v957_v39  ;;  %vm562_vm5 = vcmp.ne.f32.partialorder %v538_v15, %v538_v15 }
 0x12f   :  { %vm563_vm6 = vcmp.ne.f32.partialorder %v539_v9, %v539_v9 }
 0x130   :  { %vm564_vm7 = vcmp.ne.f32.partialorder %v540_v18, %v540_v18 }
 0x135   :  { %v672_v20 = vpop.eup %671 }
 0x136   :  { %v674_v55 = vpop.eup %673  ;;  %v553_v0 = vmul.f32 %v672_v20, %v537_v53 }
 0x137   :  { %v676_v22 = vpop.eup %675  ;;  %v554_v24 = vmul.f32 %v674_v55, %v538_v15 }
 0x138   :  { %v678_v19 = vpop.eup %677  ;;  %v555_v26 = vmul.f32 %v676_v22, %v539_v9  ;;  %v557_v61 = vsub.f32 %v517_v34, %v553_v0 }
 0x139   :  { %v556_v12 = vmul.f32 %v678_v19, %v540_v18  ;;  %v558_v28 = vsub.f32 %v518_v52, %v554_v24 }
 0x13a   :  { %v559_v33 = vsub.f32 %v519_v38, %v555_v26  ;;  %v565_v35 = vsel %vm561_vm4, %v517_v34, %v557_v61 }
 0x13b   :  { %v560_v37 = vsub.f32 %v520_v56, %v556_v12  ;;  %v566_v1 = vsel %vm562_vm5, %v518_v52, %v558_v28  ;;  %569 = vst [vmem:[#allocation10] sm:$0xff] %v565_v35 }
 0x13c   :  { %v567_v39 = vsel %vm563_vm6, %v519_v38, %v559_v33  ;;  %570 = vst [vmem:[#allocation10 + $0x8] sm:$0xff] %v566_v1 }
 0x13d   :  { %v568_v2 = vsel %vm564_vm7, %v520_v56, %v560_v37  ;;  %571 = vst [vmem:[#allocation10 + $0x10] sm:$0xff] %v567_v39 }
 0x13e   :  { %572 = vst [vmem:[#allocation10 + $0x18] sm:$0xff] %v568_v2 }
 0x13f   :  { %778 = shalt.err (!%p775_p8)
}
 0x140   :  { %s779_s15 = scalar_lea.hbm %s1134_s4, 512 }
 0x141   :  { %p780_p9 = scmp.ne.s32.totalorder %s1134_s4, %s779_s15  ;;  %p783_p10 = scmp.lt.u32.totalorder %s779_s15, %s1134_s4 }
 0x143   :  { %p785_p11 = pnand %p783_p10, %p780_p9 }
 0x145   :  { %788 = shalt.err (!%p785_p11)
}
 0x146   :  { %584 = dma.vmem_to_hbm [thread:$0]  %s579_s12, 512, %s1134_s4, [#allocation4], %s799_s27, %s799_s27, %s800_s28  }
 0x147   :  { %795 = dma.done.wait [#allocation4], 512  }
 0x148   :  { %796 = vsyncadd [#allocation4], 4294966784 }
 0x149   :  { %588 = vsyncpa [#allocation3], 1 }
 0x14a   :  { %589 = vsyncpa [#allocation6], 1 }
 0x14b   :  { %590 = vsyncpa [#allocation9], 1 }
 0x14c   :  { %591 = vsyncpa [#allocation4], 1 }

</bundles_post_ra>
